<compile_context>
chip_gen: v7x
topology: tpu7x:2x2x1
jax: 0.10.0
libtpu: 0.0.40
codegen_flags: <defaults>
</compile_context>

<pallas_src>
import functools

import jax
import jax.numpy as jnp
from jax.experimental import pallas as pl
from jax.experimental.pallas import tpu as pltpu

_LANE = 128
_SUBLANE = 8
_LOG_CLAMP = -100.0  # PyTorch BCE clamps log values at -100.


def _cdiv(a, b):
    return -(-a // b)


def _round_up(x, m):
    return _cdiv(x, m) * m


def _attribute_loss_kernel(scores_ref, targets_ref, out_ref, acc_ref, *,
                           inner_n, rows_valid, needs_mask, hard_targets):
    pid = pl.program_id(0)    # "parallel" (core) axis
    step = pl.program_id(1)   # "arbitrary" (reduction) axis

    @pl.when(step == 0)
    def _init():
        acc_ref[...] = jnp.zeros_like(acc_ref)

    tb = scores_ref.shape[0]

    prob = jnp.clip(scores_ref[...].astype(jnp.float32), 0.0, 1.0)
    tgt = targets_ref[...].astype(jnp.float32)

    if hard_targets:
        # Exact for 0/1 targets: one log per element instead of two (EUP).
        p_sel = jnp.where(tgt >= 0.5, prob, 1.0 - prob)
        loss = -jnp.maximum(jnp.log(p_sel), _LOG_CLAMP)
    else:
        # Full torch.F.binary_cross_entropy formulation (soft targets OK).
        log_p = jnp.maximum(jnp.log(prob), _LOG_CLAMP)
        log_1mp = jnp.maximum(jnp.log(1.0 - prob), _LOG_CLAMP)
        loss = -(tgt * log_p + (1.0 - tgt) * log_1mp)

    if needs_mask:
        # Zero rows belonging to ragged / clamped out-of-range blocks.
        blk = pid * inner_n + step          # unclamped global block index
        row0 = blk * tb
        row_ids = row0 + jax.lax.broadcasted_iota(jnp.int32, loss.shape, 0)
        loss = jnp.where(row_ids < rows_valid, loss, 0.0)

    # Elementwise accumulate (VPU only); cross-lane work stays in the epilogue.
    acc_ref[...] += loss

    @pl.when(step == pl.num_programs(1) - 1)
    def _finalize():
        # Sublane reduce only once per core; lane-dense (1,1,128) store.
        out_ref[...] = jnp.sum(acc_ref[...], axis=0,
                               keepdims=True).reshape(1, 1, _LANE)


def attribute_loss_pallas(attribute_scores, attribute_targets, loss_lambda=1.0,
                          *, block_rows=4096, assume_binary_targets=False):
    """Pallas equivalent of AttributeLoss.forward (BCE, mean reduction)."""
    assert attribute_scores.shape == attribute_targets.shape
    n = 1
    for d in attribute_scores.shape:
        n *= int(d)
    assert n > 0

    rows_valid = _cdiv(n, _LANE)

    # Sublane grain for the block: 8 for f32, 16 for bf16, 32 for int8.
    itemsize = min(jnp.dtype(attribute_scores.dtype).itemsize,
                   jnp.dtype(attribute_targets.dtype).itemsize)
    grain = max(_SUBLANE, 32 // max(itemsize, 1))

    if n % _LANE == 0 and rows_valid >= _SUBLANE:
        # Fast path: lane-dense reshape is a free view; no HBM pad copy.
        array_rows = rows_valid
        scores2d = attribute_scores.reshape(array_rows, _LANE)
        targets2d = attribute_targets.reshape(array_rows, _LANE)
    else:
        # Minimal zero pad (< 8*128 elements).  Padded (p=0, t=0) elements
        # contribute exactly 0 loss under the -100 log clamp (and under the
        # single-log path, log(1-0)=0).
        array_rows = max(_round_up(rows_valid, _SUBLANE), _SUBLANE)
        pad = array_rows * _LANE - n
        scores2d = jnp.pad(jnp.ravel(attribute_scores),
                           (0, pad)).reshape(array_rows, _LANE)
        targets2d = jnp.pad(jnp.ravel(attribute_targets),
                            (0, pad)).reshape(array_rows, _LANE)

    tb = _round_up(max(grain, min(block_rows, array_rows)), grain)
    grid_n = _cdiv(array_rows, tb)

    # Two-way "parallel" axis: uses both TensorCores on v7x; on single-TC
    # chips it is just a 2-way split of the serial reduction loop.
    num_parallel = 2 if grid_n >= 2 else 1
    inner_n = _cdiv(grid_n, num_parallel)
    max_blk = grid_n - 1

    # Masking is only needed when the last block is ragged or when the
    # parallel split creates extra (clamped) block indices.
    needs_mask = (array_rows % tb != 0) or (num_parallel * inner_n != grid_n)

    def in_index_map(pp, ii):
        # Clamp so DMAs stay in bounds; duplicated blocks are masked in-kernel.
        return (jnp.minimum(pp * inner_n + ii, max_blk), 0)

    kernel = functools.partial(
        _attribute_loss_kernel,
        inner_n=inner_n,
        rows_valid=rows_valid,
        needs_mask=needs_mask,
        hard_targets=bool(assume_binary_targets))

    partials = pl.pallas_call(
        kernel,
        out_shape=jax.ShapeDtypeStruct((num_parallel, 1, _LANE), jnp.float32),
        grid_spec=pltpu.PrefetchScalarGridSpec(
            num_scalar_prefetch=0,
            grid=(num_parallel, inner_n),
            in_specs=[
                pl.BlockSpec((tb, _LANE), in_index_map),
                pl.BlockSpec((tb, _LANE), in_index_map),
            ],
            out_specs=pl.BlockSpec((1, 1, _LANE), lambda pp, ii: (pp, 0, 0)),
            scratch_shapes=[pltpu.VMEM((tb, _LANE), jnp.float32)],
        ),
        compiler_params=pltpu.CompilerParams(
            dimension_semantics=("parallel", "arbitrary")),
    )(scores2d, targets2d)

    # Tiny final reduce over (num_parallel, 1, 128) + mean scaling in XLA.
    return (float(loss_lambda) / float(n)) * jnp.sum(partials)


def _reference_attribute_loss(scores, targets, loss_lambda=1.0):
    """Pure-JAX reference mirroring torch F.binary_cross_entropy semantics."""
    p = jnp.clip(scores.astype(jnp.float32), 0.0, 1.0)
    t = targets.astype(jnp.float32)
    log_p = jnp.maximum(jnp.log(p), _LOG_CLAMP)
    log_1mp = jnp.maximum(jnp.log(1.0 - p), _LOG_CLAMP)
    return loss_lambda * jnp.mean(-(t * log_p + (1.0 - t) * log_1mp))


def attribute_loss(attribute_scores, attribute_targets, loss_lambda=1.0,
                   *, min_pallas_elems=1 << 15, block_rows=4096,
                   assume_binary_targets=False):
    """Dispatcher: tiny inputs use fused XLA (pallas_call overhead dominates)."""
    n = 1
    for d in attribute_scores.shape:
        n *= int(d)
    if n < min_pallas_elems:
        return _reference_attribute_loss(
            attribute_scores, attribute_targets, loss_lambda)
    return attribute_loss_pallas(
        attribute_scores, attribute_targets, loss_lambda,
        block_rows=block_rows, assume_binary_targets=assume_binary_targets)


if __name__ == "__main__":
    key = jax.random.PRNGKey(0)

    def make_inputs(k, shape, scores_dtype=jnp.float32):
        ks, kt = jax.random.split(k)
        scores = jax.random.uniform(ks, shape, minval=-0.2, maxval=1.2)
        scores = scores.astype(scores_dtype)
        targets = (jax.random.uniform(kt, shape) > 0.5).astype(jnp.float32)
        return scores, targets

    k1, k2, k3, k4 = jax.random.split(key, 4)

    # Test 1: the module's nominal small shape (minimal-pad path, 1 block).
    s1, t1 = make_inputs(k1, (8, 32))
    out1 = jax.block_until_ready(attribute_loss_pallas(s1, t1, loss_lambda=1.0))
    ref1 = _reference_attribute_loss(s1, t1, 1.0)
    assert jnp.allclose(out1, ref1, rtol=1e-5, atol=1e-5), (out1, ref1)

    # Test 2: flat size not a multiple of 128 -> minimal zero-pad path.
    s2, t2 = make_inputs(k2, (16, 100))
    out2 = jax.block_until_ready(attribute_loss_pallas(s2, t2, loss_lambda=0.5))
    ref2 = _reference_attribute_loss(s2, t2, 0.5)
    assert jnp.allclose(out2, ref2, rtol=1e-5, atol=1e-5), (out2, ref2)

    # Test 3: no-pad fast path, multi-step accumulation, two-way parallel
    # split, ragged last block AND a clamped out-of-range block (mask path).
    s3, t3 = make_inputs(k3, (32, 1024))
    out3 = jax.block_until_ready(
        attribute_loss_pallas(s3, t3, loss_lambda=2.0, block_rows=56))
    ref3 = _reference_attribute_loss(s3, t3, 2.0)
    assert jnp.allclose(out3, ref3, rtol=1e-5, atol=1e-5), (out3, ref3)

    # Test 3b: single-log path (exact for hard 0/1 targets).
    out3b = jax.block_until_ready(
        attribute_loss_pallas(s3, t3, loss_lambda=2.0, block_rows=56,
                              assume_binary_targets=True))
    assert jnp.allclose(out3b, ref3, rtol=1e-5, atol=1e-5), (out3b, ref3)

    # Test 4: bf16 scores (half the HBM bytes), default big block, no pad.
    s4, t4 = make_inputs(k4, (64, 512), scores_dtype=jnp.bfloat16)
    out4 = jax.block_until_ready(attribute_loss_pallas(s4, t4, loss_lambda=1.0))
    ref4 = _reference_attribute_loss(s4, t4, 1.0)
    assert jnp.allclose(out4, ref4, rtol=1e-4, atol=1e-4), (out4, ref4)

    print("KERNEL_OK")
</pallas_src>

<mosaic_0001>
module attributes {stable_mosaic.version = 11 : i64} {
  func.func @_attribute_loss_kernel(%arg0: i32, %arg1: i32, %arg2: memref<8x128xf32, #tpu.memory_space<vmem>>, %arg3: memref<8x128xf32, #tpu.memory_space<vmem>>, %arg4: memref<1x1x128xf32, #tpu.memory_space<vmem>>, %arg5: memref<8x128xf32, #tpu.memory_space<vmem>>) attributes {dimension_semantics = [#tpu.dimension_semantics<parallel>, #tpu.dimension_semantics<arbitrary>], iteration_bounds = array<i64: 1, 1>, scalar_prefetch = 0 : i64, scratch_operands = 1 : i64, tpu.core_type = #tpu.core_type<tc>, window_params = [{transform_indices = @transform_0, window_bounds = array<i64: 8, 128>}, {transform_indices = @transform_1, window_bounds = array<i64: 8, 128>}, {transform_indices = @transform_2, window_bounds = array<i64: 1, 1, 128>}]} {
    %c0_i32 = arith.constant 0 : i32
    %0 = arith.cmpi eq, %arg1, %c0_i32 : i32
    %1 = arith.extui %0 : i1 to i32
    %c0_i32_0 = arith.constant 0 : i32
    %2 = arith.cmpi ne, %1, %c0_i32_0 : i32
    scf.if %2 {
      %cst_16 = arith.constant 0.000000e+00 : f32
      %30 = vector.broadcast %cst_16 : f32 to vector<8x128xf32>
      %c0_17 = arith.constant 0 : index
      %c0_18 = arith.constant 0 : index
      %31 = vector.load %arg5[%c0_17, %c0_18] : memref<8x128xf32, #tpu.memory_space<vmem>>, vector<8x128xf32>
      tpu.vector_store %arg5[%c0_17, %c0_18], %30 {strides = array<i32>} : memref<8x128xf32, #tpu.memory_space<vmem>>, vector<8x128xf32>,
    } else {
    }
    %c0 = arith.constant 0 : index
    %c0_1 = arith.constant 0 : index
    %3 = vector.load %arg2[%c0, %c0_1] : memref<8x128xf32, #tpu.memory_space<vmem>>, vector<8x128xf32>
    %cst = arith.constant 0.000000e+00 : f32
    %cst_2 = arith.constant 1.000000e+00 : f32
    %4 = vector.broadcast %cst : f32 to vector<8x128xf32>
    %5 = arith.maximumf %4, %3 : vector<8x128xf32>
    %6 = vector.broadcast %cst_2 : f32 to vector<8x128xf32>
    %7 = arith.minimumf %6, %5 : vector<8x128xf32>
    %c0_3 = arith.constant 0 : index
    %c0_4 = arith.constant 0 : index
    %8 = vector.load %arg3[%c0_3, %c0_4] : memref<8x128xf32, #tpu.memory_space<vmem>>, vector<8x128xf32>
    %9 = math.log %7 : vector<8x128xf32>
    %cst_5 = arith.constant -1.000000e+02 : f32
    %10 = vector.broadcast %cst_5 : f32 to vector<8x128xf32>
    %11 = arith.maximumf %9, %10 : vector<8x128xf32>
    %cst_6 = arith.constant 1.000000e+00 : f32
    %12 = vector.broadcast %cst_6 : f32 to vector<8x128xf32>
    %13 = arith.subf %12, %7 : vector<8x128xf32>
    %14 = math.log %13 : vector<8x128xf32>
    %cst_7 = arith.constant -1.000000e+02 : f32
    %15 = vector.broadcast %cst_7 : f32 to vector<8x128xf32>
    %16 = arith.maximumf %14, %15 : vector<8x128xf32>
    %17 = arith.mulf %8, %11 : vector<8x128xf32>
    %cst_8 = arith.constant 1.000000e+00 : f32
    %18 = vector.broadcast %cst_8 : f32 to vector<8x128xf32>
    %19 = arith.subf %18, %8 : vector<8x128xf32>
    %20 = arith.mulf %19, %16 : vector<8x128xf32>
    %21 = arith.addf %17, %20 : vector<8x128xf32>
    %cst_9 = arith.constant 0.000000e+00 : f32
    %22 = vector.broadcast %cst_9 : f32 to vector<8x128xf32>
    %23 = arith.subf %22, %21 : vector<8x128xf32>
    %c0_10 = arith.constant 0 : index
    %c0_11 = arith.constant 0 : index
    %24 = vector.load %arg5[%c0_10, %c0_11] : memref<8x128xf32, #tpu.memory_space<vmem>>, vector<8x128xf32>
    %25 = arith.addf %24, %23 : vector<8x128xf32>
    %c0_12 = arith.constant 0 : index
    %c0_13 = arith.constant 0 : index
    %26 = vector.load %arg5[%c0_12, %c0_13] : memref<8x128xf32, #tpu.memory_space<vmem>>, vector<8x128xf32>
    tpu.vector_store %arg5[%c0_12, %c0_13], %25 {strides = array<i32>} : memref<8x128xf32, #tpu.memory_space<vmem>>, vector<8x128xf32>,
    %c0_i32_14 = arith.constant 0 : i32
    %27 = arith.cmpi eq, %arg1, %c0_i32_14 : i32
    %28 = arith.extui %27 : i1 to i32
    %c0_i32_15 = arith.constant 0 : i32
    %29 = arith.cmpi ne, %28, %c0_i32_15 : i32
    scf.if %29 {
      %c0_16 = arith.constant 0 : index
      %c0_17 = arith.constant 0 : index
      %30 = vector.load %arg5[%c0_16, %c0_17] : memref<8x128xf32, #tpu.memory_space<vmem>>, vector<8x128xf32>
      %cst_18 = arith.constant dense<0.000000e+00> : vector<128xf32>
      %31 = vector.multi_reduction <add>, %30, %cst_18 [0] : vector<8x128xf32> to vector<128xf32>
      %32 = vector.shape_cast %31 : vector<128xf32> to vector<1x128xf32>
      %33 = vector.shape_cast %32 : vector<1x128xf32> to vector<1x1x128xf32>
      %c0_19 = arith.constant 0 : index
      %c0_20 = arith.constant 0 : index
      %c0_21 = arith.constant 0 : index
      %34 = vector.load %arg4[%c0_19, %c0_20, %c0_21] : memref<1x1x128xf32, #tpu.memory_space<vmem>>, vector<1x1x128xf32>
      tpu.vector_store %arg4[%c0_19, %c0_20, %c0_21], %33 {strides = array<i32>} : memref<1x1x128xf32, #tpu.memory_space<vmem>>, vector<1x1x128xf32>,
    } else {
    }
    return
  }
  func.func @transform_0(%arg0: i32, %arg1: i32) -> (i32, i32) {
    %c1_i32 = arith.constant 1 : i32
    %0 = arith.muli %arg0, %c1_i32 : i32
    %1 = arith.addi %0, %arg1 : i32
    %c0_i32 = arith.constant 0 : i32
    %2 = arith.minsi %1, %c0_i32 : i32
    %c0_i32_0 = arith.constant 0 : i32
    %c0_i32_1 = arith.constant 0 : i32
    return %2, %c0_i32_0 : i32, i32
  }
  func.func @transform_1(%arg0: i32, %arg1: i32) -> (i32, i32) {
    %c1_i32 = arith.constant 1 : i32
    %0 = arith.muli %arg0, %c1_i32 : i32
    %1 = arith.addi %0, %arg1 : i32
    %c0_i32 = arith.constant 0 : i32
    %2 = arith.minsi %1, %c0_i32 : i32
    %c0_i32_0 = arith.constant 0 : i32
    %c0_i32_1 = arith.constant 0 : i32
    return %2, %c0_i32_0 : i32, i32
  }
  func.func @transform_2(%arg0: i32, %arg1: i32) -> (i32, i32, i32) {
    %c0_i32 = arith.constant 0 : i32
    %c0_i32_0 = arith.constant 0 : i32
    %c0_i32_1 = arith.constant 0 : i32
    return %arg0, %c0_i32, %c0_i32_0 : i32, i32, i32
  }
}

</mosaic_0001>

<bundles_post_ra>
// kernel: tpu_custom_call.1
= control target key start
LH: loop header
LB: loop body
LE: loop exit
PB: predicated region body
PF: predicated region fallthrough
CT: control target
= control target key end

     0   :  { %7 = vsyncpa [#allocation4], 0  ;;  %s240_s0 = inlined_call_operand.hbm [shape: f32[8,128], index: 0, kind: input, shape index: {}]   ;;  %s241_s1 = inlined_call_operand.hbm [shape: f32[8,128], index: 1, kind: input, shape index: {}]   ;;  %s242_s2 = inlined_call_operand.hbm [shape: f32[1,1,128], index: 2, kind: output, shape index: {}]  }
   0x1   :  { %8 = vsyncpa [#allocation7], 0 }
   0x2   :  { %9 = vsyncpa [#allocation5], 0  ;;  %s186_s9 = smov [#allocation3]   ;;  %s187_s11 = smov [#allocation6]  }
   0x3   :  { %s21_s10 = sshll.u32 %s186_s9, 4  ;;  %s36_s12 = sshll.u32 %s187_s11, 4  ;;  %s22_s10 = int_to_ptr.vmem [resolvable:$true] %s21_s10  ;;  %s37_s12 = int_to_ptr.vmem [resolvable:$true] %s36_s12 }
   0x4   :  { %s114_s15 = scalar_lea.hbm %s240_s0, 128 }
   0x5   :  { %p115_p0 = scmp.ne.s32.totalorder %s240_s0, %s114_s15  ;;  %p118_p1 = scmp.lt.u32.totalorder %s114_s15, %s240_s0 }
   0x7   :  { %p120_p2 = pnand %p118_p1, %p115_p0 }
   0x9   :  { %123 = shalt.err (!%p120_p2)
}
   0xa   :  { %s124_s20 = scalar_lea.vmem %s22_s10, 128  ;;  %p129_p4 = scmp.lt.s32.totalorder %s22_s10, %s22_s10 }
   0xb   :  { %p125_p3 = scmp.ne.s32.totalorder %s22_s10, %s124_s20  ;;  %p130_p5 = scmp.lt.s32.totalorder %s124_s20, %s124_s20 }
   0xd   :  { %p131_p6 = por %p130_p5, %p129_p4 }
   0xf   :  { %p132_p7 = pnand %p131_p6, %p125_p3 }
  0x11   :  { %135 = shalt.err (!%p132_p7)
}
  0x12   :  { %24 = dma.hbm_to_vmem [thread:$0]  %s240_s0, 128, %s22_s10, [#allocation4]  }
  0x13   :  { %s136_s25 = scalar_lea.hbm %s241_s1, 128 }
  0x14   :  { %p137_p8 = scmp.ne.s32.totalorder %s241_s1, %s136_s25  ;;  %p140_p9 = scmp.lt.u32.totalorder %s136_s25, %s241_s1 }
  0x16   :  { %p142_p10 = pnand %p140_p9, %p137_p8 }
  0x18   :  { %145 = shalt.err (!%p142_p10)
}
  0x19   :  { %s146_s30 = scalar_lea.vmem %s37_s12, 128  ;;  %p151_p12 = scmp.lt.s32.totalorder %s37_s12, %s37_s12 }
  0x1a   :  { %p147_p11 = scmp.ne.s32.totalorder %s37_s12, %s146_s30  ;;  %p152_p13 = scmp.lt.s32.totalorder %s146_s30, %s146_s30 }
  0x1c   :  { %p153_p0 = por %p152_p13, %p151_p12 }
  0x1e   :  { %p154_p1 = pnand %p153_p0, %p147_p11 }
  0x20   :  { %157 = shalt.err (!%p154_p1)
}
  0x21   :  { %39 = dma.hbm_to_vmem [thread:$0]  %s241_s1, 128, %s37_s12, [#allocation7]  }
  0x22   :  { %180 = dma.done.wait [#allocation4], 128  }
  0x23   :  { %181 = vsyncadd [#allocation4], 4294967168 }
  0x24   :  { %182 = dma.done.wait [#allocation7], 128  }
  0x25   :  { %183 = vsyncadd [#allocation7], 4294967168  ;;  %v57_v0 = vld [vmem:[#allocation3] sm:$0xff]  ;;  %v60_v5 = vld [vmem:[#allocation6] sm:$0xff]  ;;  %s188_s1 = smov [#allocation8]  }
  0x26   :  { %v58_v1 = vmax.f32 %v57_v0, 0.0  ;;  %v69_v10 = vsub.f32 1.0, %v60_v5  ;;  %s93_s4 = sshll.u32 %s188_s1, 4  ;;  %s94_s4 = int_to_ptr.vmem [resolvable:$true] %s93_s4 }
  0x27   :  { %s158_s5 = scalar_lea.vmem %s94_s4, 16  ;;  %s162_s6 = scalar_lea.vmem %s94_s4, 32 }
  0x28   :  { %v59_v2 = vmin.f32 %v58_v1, 1.0  ;;  %p159_p2 = scmp.ne.s32.totalorder %s94_s4, %s158_s5  ;;  %p163_p3 = scmp.lt.s32.totalorder %s94_s4, %s94_s4 }
  0x29   :  { %p164_p4 = scmp.lt.s32.totalorder %s162_s6, %s158_s5 }
  0x2a   :  { %110 = vlog2.f32 %v59_v2  ;;  %v64_v3 = vsub.f32 1.0, %v59_v2 }
  0x2b   :  { %p165_p5 = por %p164_p4, %p163_p3 }
  0x2c   :  { %112 = vlog2.f32 %v64_v3 }
  0x2d   :  { %p166_p6 = pnand %p165_p5, %p159_p2 }
  0x34   :  { %v111_v4 = vpop.eup %110 }
  0x35   :  { %v62_v6 = vmul.f32 0.6931472, %v111_v4 }
  0x36   :  { %v113_v7 = vpop.eup %112 }
  0x37   :  { %v63_v8 = vmax.f32 %v62_v6, -100.0  ;;  %v66_v9 = vmul.f32 0.6931472, %v113_v7 }
  0x39   :  { %v67_v11 = vmax.f32 %v66_v9, -100.0  ;;  %v68_v12 = vmul.f32 %v63_v8, %v60_v5 }
  0x3b   :  { %v70_v13 = vmul.f32 %v69_v10, %v67_v11 }
  0x3d   :  { %v71_v14 = vadd.f32 %v70_v13, %v68_v12 }
  0x3f   :  { %v72_v15 = vsub.f32 0.0, %v71_v14 }
  0x41   :  { %v80_v16 = vrot.slane %v72_v15, 4 }
  0x43   :  { %v81_v17 = vadd.f32 %v80_v16, %v72_v15 }
  0x45   :  { %v82_v18 = vrot.slane %v81_v17, 2 }
  0x47   :  { %v83_v19 = vadd.f32 %v82_v18, %v81_v17 }
  0x49   :  { %v84_v20 = vrot.slane %v83_v19, 1 }
  0x4b   :  { %v85_v21 = vadd.f32 %v84_v20, %v83_v19 }
  0x4d   :  { %86 = vst [vmem:[#allocation8] sm:$0x1] %v85_v21 }
  0x4e   :  { %169 = shalt.err (!%p166_p6)
}
  0x4f   :  { %s170_s9 = scalar_lea.hbm %s242_s2, 16 }
  0x50   :  { %p171_p7 = scmp.ne.s32.totalorder %s242_s2, %s170_s9  ;;  %p174_p8 = scmp.lt.u32.totalorder %s170_s9, %s242_s2 }
  0x52   :  { %p176_p9 = pnand %p174_p8, %p171_p7 }
  0x54   :  { %179 = shalt.err (!%p176_p9)
}
  0x55   :  { %96 = dma.vmem_to_hbm [thread:$0]  %s94_s4, 16, %s242_s2, [#allocation5]  }
  0x56   :  { %184 = dma.done.wait [#allocation5], 16  }
  0x57   :  { %185 = vsyncadd [#allocation5], 4294967280 }
  0x58   :  { %100 = vsyncpa [#allocation4], 1 }
  0x59   :  { %101 = vsyncpa [#allocation7], 1 }
  0x5a   :  { %102 = vsyncpa [#allocation5], 1 }

</bundles_post_ra>
